<compile_context>
chip_gen: v7x
topology: tpu7x:2x2x1
jax: 0.10.0
libtpu: 0.0.40
codegen_flags: <defaults>
</compile_context>

<pallas_src>
import functools

import jax
import jax.numpy as jnp
from jax import lax
from jax.experimental import pallas as pl
from jax.experimental.pallas import tpu as pltpu

EPS = 1e-4
NEG_SLOPE = 0.01


def _round_up(a, b):
    return (a + b - 1) // b * b


def _linear_bn_lrelu_kernel(x_ref, w_ref, o_ref, sum_ref, sumsq_ref,
                            *, n_valid, eps, neg_slope):
    p = pl.program_id(0)          # 0 = stats pass, 1 = normalize pass
    i = pl.program_id(1)          # batch-tile index
    n_tiles = pl.num_programs(1)

    # Linear (no bias): MXU matmul, bf16 (or f32) operands, f32 accumulation.
    y = jnp.dot(x_ref[...], w_ref[...], preferred_element_type=jnp.float32)

    @pl.when(p == 0)
    def _stats():
        @pl.when(i == 0)
        def _init():
            sum_ref[...] = jnp.zeros_like(sum_ref)
            sumsq_ref[...] = jnp.zeros_like(sumsq_ref)

        # Zero-padded rows contribute exactly 0 to both accumulators.
        sum_ref[...] += jnp.sum(y, axis=0, keepdims=True)
        sumsq_ref[...] += jnp.sum(y * y, axis=0, keepdims=True)

        @pl.when(i == n_tiles - 1)
        def _finalize():
            inv_n = 1.0 / float(n_valid)                  # true batch size (static)
            mean = sum_ref[...] * inv_n
            var = jnp.maximum(sumsq_ref[...] * inv_n - mean * mean, 0.0)  # biased var
            sum_ref[...] = mean                           # reuse scratch: mean
            sumsq_ref[...] = lax.rsqrt(var + eps)         # reuse scratch: rstd (EUP)

    @pl.when(p == 1)
    def _normalize():
        y_hat = (y - sum_ref[...]) * sumsq_ref[...]       # affine=False: no gamma/beta
        o_ref[...] = jnp.where(y_hat > 0, y_hat, neg_slope * y_hat).astype(o_ref.dtype)


def linear_bn_leaky_relu(x, w_t, *, eps=EPS, neg_slope=NEG_SLOPE,
                         block_n=512, matmul_dtype=jnp.bfloat16):
    """x: [N, in_features], w_t: [in_features, out_features] -> [N, out_features] (f32)."""
    n, k = x.shape
    k2, f = w_t.shape
    assert k == k2, "weight must be pre-transposed to [in_features, out_features]"

    # Lane-dense feature dim (multiple of 128); batch tile multiple of 16 (bf16 sublanes).
    f_pad = _round_up(f, 128)
    tm = _round_up(min(block_n, _round_up(n, 16)), 16)
    n_pad = _round_up(n, tm)
    n_tiles = n_pad // tm

    xd = x.astype(matmul_dtype)
    wd = w_t.astype(matmul_dtype)
    if n_pad != n:
        xd = jnp.pad(xd, ((0, n_pad - n), (0, 0)))        # zero rows: no effect on stats
    if f_pad != f:
        wd = jnp.pad(wd, ((0, 0), (0, f_pad - f)))        # zero cols: normalize to 0, sliced off

    kernel = functools.partial(_linear_bn_lrelu_kernel,
                               n_valid=n, eps=eps, neg_slope=neg_slope)

    # VMEM budget (double-buffered blocks + scratch) with headroom; v7x physical VMEM = 64 MiB.
    itemsize = jnp.dtype(matmul_dtype).itemsize
    vmem_est = (2 * tm * k * itemsize          # x tiles (double-buffered)
                + 2 * k * f_pad * itemsize     # weight (resident; budget 2 buffers)
                + 2 * tm * f_pad * 4           # output tiles (f32)
                + 2 * f_pad * 4)               # sum / sumsq scratch
    vmem_limit = int(min(max(4 * 1024 * 1024, 2 * vmem_est), 48 * 1024 * 1024))

    out = pl.pallas_call(
        kernel,
        out_shape=jax.ShapeDtypeStruct((n_pad, f_pad), jnp.float32),
        grid_spec=pltpu.PrefetchScalarGridSpec(
            num_scalar_prefetch=0,
            grid=(2, n_tiles),                                   # (pass, batch tile)
            in_specs=[
                pl.BlockSpec((tm, k), lambda p, i: (i, 0)),      # x tile
                pl.BlockSpec((k, f_pad), lambda p, i: (0, 0)),   # weight, VMEM-resident
            ],
            # i*p -> during the stats pass (p=0) the output block index never changes,
            # so nothing is flushed to HBM until pass 1 writes the real data.
            out_specs=pl.BlockSpec((tm, f_pad), lambda p, i: (i * p, 0)),
            scratch_shapes=[
                pltpu.VMEM((1, f_pad), jnp.float32),   # running sum  -> mean
                pltpu.VMEM((1, f_pad), jnp.float32),   # running sumsq -> rstd
            ],
        ),
        compiler_params=pltpu.CompilerParams(
            # Stats accumulation makes the tile axis a carried dependency -> "arbitrary".
            dimension_semantics=("arbitrary", "arbitrary"),
            vmem_limit_bytes=vmem_limit,
        ),
    )(xd, wd)

    return out[:n, :f]


def reference(x, w_t, matmul_dtype=jnp.float32, eps=EPS, neg_slope=NEG_SLOPE):
    y = jnp.dot(x.astype(matmul_dtype), w_t.astype(matmul_dtype),
                preferred_element_type=jnp.float32)
    mean = jnp.mean(y, axis=0, keepdims=True)
    var = jnp.mean((y - mean) ** 2, axis=0, keepdims=True)
    y_hat = (y - mean) / jnp.sqrt(var + eps)
    return jnp.where(y_hat > 0, y_hat, neg_slope * y_hat)


if __name__ == "__main__":
    key = jax.random.PRNGKey(0)
    kx, kw, kx2, kw2 = jax.random.split(key, 4)

    # --- Test 1: module-sized shapes (batch=8, in=32, out=64), exact f32 matmul path ---
    batch, in_features, out_features = 8, 32, 64
    x = jax.random.normal(kx, (batch, in_features), dtype=jnp.float32)
    bound = 1.0 / (in_features ** 0.5)
    w = jax.random.uniform(kw, (out_features, in_features),
                           minval=-bound, maxval=bound, dtype=jnp.float32)
    w_t = w.T  # [in_features, out_features]

    out_f32 = jax.block_until_ready(
        linear_bn_leaky_relu(x, w_t, matmul_dtype=jnp.float32))
    ref_f32 = reference(x, w_t, matmul_dtype=jnp.float32)
    assert out_f32.shape == (batch, out_features)
    assert jnp.allclose(out_f32, ref_f32, atol=1e-4, rtol=1e-4), "f32 path mismatch"

    # --- Test 2: default bf16-MXU path (BN/LeakyReLU still in f32) ---
    out_bf16 = jax.block_until_ready(linear_bn_leaky_relu(x, w_t))
    ref_bf16 = reference(x, w_t, matmul_dtype=jnp.bfloat16)
    assert jnp.allclose(out_bf16, ref_bf16, atol=1e-3, rtol=1e-3), "bf16 path mismatch"
    assert jnp.allclose(out_bf16, ref_f32, atol=8e-2, rtol=5e-2), "bf16 drift vs f32 too large"

    # --- Test 3: multi-tile + padding path (N, F not aligned; 3 batch tiles) ---
    n2, k2, f2 = 300, 96, 200
    x2 = jax.random.normal(kx2, (n2, k2), dtype=jnp.float32)
    b2 = 1.0 / (k2 ** 0.5)
    w2 = jax.random.uniform(kw2, (f2, k2), minval=-b2, maxval=b2, dtype=jnp.float32)
    out2 = jax.block_until_ready(
        linear_bn_leaky_relu(x2, w2.T, matmul_dtype=jnp.float32, block_n=128))
    ref2 = reference(x2, w2.T, matmul_dtype=jnp.float32)
    assert out2.shape == (n2, f2)
    assert jnp.allclose(out2, ref2, atol=1e-4, rtol=1e-4), "tiled path mismatch"

    print("KERNEL_OK")
</pallas_src>

<mosaic_0001>
module attributes {stable_mosaic.version = 11 : i64} {
  func.func @_linear_bn_lrelu_kernel(%arg0: i32, %arg1: i32, %arg2: memref<16x32xf32, #tpu.memory_space<vmem>>, %arg3: memref<32x128xf32, #tpu.memory_space<vmem>>, %arg4: memref<16x128xf32, #tpu.memory_space<vmem>>, %arg5: memref<1x128xf32, #tpu.memory_space<vmem>>, %arg6: memref<1x128xf32, #tpu.memory_space<vmem>>) attributes {dimension_semantics = [#tpu.dimension_semantics<arbitrary>, #tpu.dimension_semantics<arbitrary>], iteration_bounds = array<i64: 2, 1>, scalar_prefetch = 0 : i64, scratch_operands = 2 : i64, tpu.core_type = #tpu.core_type<tc>, window_params = [{transform_indices = @transform_0, window_bounds = array<i64: 16, 32>}, {pipeline_mode = #tpu.pipeline_mode<synchronous>, transform_indices = @transform_1, window_bounds = array<i64: 32, 128>}, {transform_indices = @transform_2, window_bounds = array<i64: 16, 128>}]} {
    %c0 = arith.constant 0 : index
    %c0_0 = arith.constant 0 : index
    %0 = vector.load %arg2[%c0, %c0_0] : memref<16x32xf32, #tpu.memory_space<vmem>>, vector<16x32xf32>
    %c0_1 = arith.constant 0 : index
    %c0_2 = arith.constant 0 : index
    %1 = vector.load %arg3[%c0_1, %c0_2] : memref<32x128xf32, #tpu.memory_space<vmem>>, vector<32x128xf32>
    %cst = arith.constant dense<0.000000e+00> : vector<16x128xf32>
    %2 = tpu.matmul %0, %1, %cst {dimension_numbers = #tpu.dot_dimension_numbers<[1], [0], [0], [1], [0, 0, 1, 1], [], []>} : vector<16x32xf32>, vector<32x128xf32>, vector<16x128xf32> -> vector<16x128xf32>
    %c0_i32 = arith.constant 0 : i32
    %3 = arith.cmpi eq, %arg0, %c0_i32 : i32
    %4 = arith.extui %3 : i1 to i32
    %c0_i32_3 = arith.constant 0 : i32
    %5 = arith.cmpi ne, %4, %c0_i32_3 : i32
    scf.if %5 {
      %c0_i32_5 = arith.constant 0 : i32
      %9 = arith.cmpi eq, %arg1, %c0_i32_5 : i32
      %10 = arith.extui %9 : i1 to i32
      %c0_i32_6 = arith.constant 0 : i32
      %11 = arith.cmpi ne, %10, %c0_i32_6 : i32
      scf.if %11 {
        %cst_19 = arith.constant 0.000000e+00 : f32
        %26 = vector.broadcast %cst_19 : f32 to vector<1x128xf32>
        %c0_20 = arith.constant 0 : index
        %c0_21 = arith.constant 0 : index
        %27 = vector.load %arg5[%c0_20, %c0_21] : memref<1x128xf32, #tpu.memory_space<vmem>>, vector<1x128xf32>
        tpu.vector_store %arg5[%c0_20, %c0_21], %26 {strides = array<i32>} : memref<1x128xf32, #tpu.memory_space<vmem>>, vector<1x128xf32>,
        %cst_22 = arith.constant 0.000000e+00 : f32
        %28 = vector.broadcast %cst_22 : f32 to vector<1x128xf32>
        %c0_23 = arith.constant 0 : index
        %c0_24 = arith.constant 0 : index
        %29 = vector.load %arg6[%c0_23, %c0_24] : memref<1x128xf32, #tpu.memory_space<vmem>>, vector<1x128xf32>
        tpu.vector_store %arg6[%c0_23, %c0_24], %28 {strides = array<i32>} : memref<1x128xf32, #tpu.memory_space<vmem>>, vector<1x128xf32>,
      } else {
      }
      %c0_7 = arith.constant 0 : index
      %c0_8 = arith.constant 0 : index
      %12 = vector.load %arg5[%c0_7, %c0_8] : memref<1x128xf32, #tpu.memory_space<vmem>>, vector<1x128xf32>
      %cst_9 = arith.constant dense<0.000000e+00> : vector<128xf32>
      %13 = vector.multi_reduction <add>, %2, %cst_9 [0] : vector<16x128xf32> to vector<128xf32>
      %14 = vector.shape_cast %13 : vector<128xf32> to vector<1x128xf32>
      %15 = arith.addf %12, %14 : vector<1x128xf32>
      %c0_10 = arith.constant 0 : index
      %c0_11 = arith.constant 0 : index
      %16 = vector.load %arg5[%c0_10, %c0_11] : memref<1x128xf32, #tpu.memory_space<vmem>>, vector<1x128xf32>
      tpu.vector_store %arg5[%c0_10, %c0_11], %15 {strides = array<i32>} : memref<1x128xf32, #tpu.memory_space<vmem>>, vector<1x128xf32>,
      %c0_12 = arith.constant 0 : index
      %c0_13 = arith.constant 0 : index
      %17 = vector.load %arg6[%c0_12, %c0_13] : memref<1x128xf32, #tpu.memory_space<vmem>>, vector<1x128xf32>
      %18 = arith.mulf %2, %2 : vector<16x128xf32>
      %cst_14 = arith.constant dense<0.000000e+00> : vector<128xf32>
      %19 = vector.multi_reduction <add>, %18, %cst_14 [0] : vector<16x128xf32> to vector<128xf32>
      %20 = vector.shape_cast %19 : vector<128xf32> to vector<1x128xf32>
      %21 = arith.addf %17, %20 : vector<1x128xf32>
      %c0_15 = arith.constant 0 : index
      %c0_16 = arith.constant 0 : index
      %22 = vector.load %arg6[%c0_15, %c0_16] : memref<1x128xf32, #tpu.memory_space<vmem>>, vector<1x128xf32>
      tpu.vector_store %arg6[%c0_15, %c0_16], %21 {strides = array<i32>} : memref<1x128xf32, #tpu.memory_space<vmem>>, vector<1x128xf32>,
      %c0_i32_17 = arith.constant 0 : i32
      %23 = arith.cmpi eq, %arg1, %c0_i32_17 : i32
      %24 = arith.extui %23 : i1 to i32
      %c0_i32_18 = arith.constant 0 : i32
      %25 = arith.cmpi ne, %24, %c0_i32_18 : i32
      scf.if %25 {
        %c0_19 = arith.constant 0 : index
        %c0_20 = arith.constant 0 : index
        %26 = vector.load %arg5[%c0_19, %c0_20] : memref<1x128xf32, #tpu.memory_space<vmem>>, vector<1x128xf32>
        %cst_21 = arith.constant 1.250000e-01 : f32
        %27 = vector.broadcast %cst_21 : f32 to vector<1x128xf32>
        %28 = arith.mulf %26, %27 : vector<1x128xf32>
        %c0_22 = arith.constant 0 : index
        %c0_23 = arith.constant 0 : index
        %29 = vector.load %arg6[%c0_22, %c0_23] : memref<1x128xf32, #tpu.memory_space<vmem>>, vector<1x128xf32>
        %cst_24 = arith.constant 1.250000e-01 : f32
        %30 = vector.broadcast %cst_24 : f32 to vector<1x128xf32>
        %31 = arith.mulf %29, %30 : vector<1x128xf32>
        %32 = arith.mulf %28, %28 : vector<1x128xf32>
        %33 = arith.subf %31, %32 : vector<1x128xf32>
        %cst_25 = arith.constant 0.000000e+00 : f32
        %34 = vector.broadcast %cst_25 : f32 to vector<1x128xf32>
        %35 = arith.maximumf %33, %34 : vector<1x128xf32>
        %c0_26 = arith.constant 0 : index
        %c0_27 = arith.constant 0 : index
        %36 = vector.load %arg5[%c0_26, %c0_27] : memref<1x128xf32, #tpu.memory_space<vmem>>, vector<1x128xf32>
        tpu.vector_store %arg5[%c0_26, %c0_27], %28 {strides = array<i32>} : memref<1x128xf32, #tpu.memory_space<vmem>>, vector<1x128xf32>,
        %cst_28 = arith.constant 9.99999974E-5 : f32
        %37 = vector.broadcast %cst_28 : f32 to vector<1x128xf32>
        %38 = arith.addf %35, %37 : vector<1x128xf32>
        %39 = math.rsqrt %38 : vector<1x128xf32>
        %c0_29 = arith.constant 0 : index
        %c0_30 = arith.constant 0 : index
        %40 = vector.load %arg6[%c0_29, %c0_30] : memref<1x128xf32, #tpu.memory_space<vmem>>, vector<1x128xf32>
        tpu.vector_store %arg6[%c0_29, %c0_30], %39 {strides = array<i32>} : memref<1x128xf32, #tpu.memory_space<vmem>>, vector<1x128xf32>,
      } else {
      }
    } else {
    }
    %c1_i32 = arith.constant 1 : i32
    %6 = arith.cmpi eq, %arg0, %c1_i32 : i32
    %7 = arith.extui %6 : i1 to i32
    %c0_i32_4 = arith.constant 0 : i32
    %8 = arith.cmpi ne, %7, %c0_i32_4 : i32
    scf.if %8 {
      %c0_5 = arith.constant 0 : index
      %c0_6 = arith.constant 0 : index
      %9 = vector.load %arg5[%c0_5, %c0_6] : memref<1x128xf32, #tpu.memory_space<vmem>>, vector<1x128xf32>
      %10 = vector.broadcast %9 : vector<1x128xf32> to vector<16x128xf32>
      %11 = arith.subf %2, %10 : vector<16x128xf32>
      %c0_7 = arith.constant 0 : index
      %c0_8 = arith.constant 0 : index
      %12 = vector.load %arg6[%c0_7, %c0_8] : memref<1x128xf32, #tpu.memory_space<vmem>>, vector<1x128xf32>
      %13 = vector.broadcast %12 : vector<1x128xf32> to vector<16x128xf32>
      %14 = arith.mulf %11, %13 : vector<16x128xf32>
      %cst_9 = arith.constant 0.000000e+00 : f32
      %15 = vector.broadcast %cst_9 : f32 to vector<16x128xf32>
      %16 = arith.cmpf ogt, %14, %15 : vector<16x128xf32>
      %cst_10 = arith.constant 0.00999999977 : f32
      %17 = vector.broadcast %cst_10 : f32 to vector<16x128xf32>
      %18 = arith.mulf %17, %14 : vector<16x128xf32>
      %19 = arith.select %16, %14, %18 : vector<16x128xi1>, vector<16x128xf32>
      %c0_11 = arith.constant 0 : index
      %c0_12 = arith.constant 0 : index
      %20 = vector.load %arg4[%c0_11, %c0_12] : memref<16x128xf32, #tpu.memory_space<vmem>>, vector<16x128xf32>
      tpu.vector_store %arg4[%c0_11, %c0_12], %19 {strides = array<i32>} : memref<16x128xf32, #tpu.memory_space<vmem>>, vector<16x128xf32>,
    } else {
    }
    return
  }
  func.func @transform_0(%arg0: i32, %arg1: i32) -> (i32, i32) {
    %c0_i32 = arith.constant 0 : i32
    %c0_i32_0 = arith.constant 0 : i32
    return %arg1, %c0_i32 : i32, i32
  }
  func.func @transform_1(%arg0: i32, %arg1: i32) -> (i32, i32) {
    %c0_i32 = arith.constant 0 : i32
    %c0_i32_0 = arith.constant 0 : i32
    %c0_i32_1 = arith.constant 0 : i32
    return %c0_i32, %c0_i32_0 : i32, i32
  }
  func.func @transform_2(%arg0: i32, %arg1: i32) -> (i32, i32) {
    %0 = arith.muli %arg1, %arg0 : i32
    %c0_i32 = arith.constant 0 : i32
    %c0_i32_0 = arith.constant 0 : i32
    return %0, %c0_i32 : i32, i32
  }
}

</mosaic_0001>

<bundles_post_ra>
// kernel: tpu_custom_call.1
= control target key start
LH: loop header
LB: loop body
LE: loop exit
PB: predicated region body
PF: predicated region fallthrough
CT: control target
= control target key end

     0   :  { %7 = vsyncpa [#allocation5], 0  ;;  %s823_s0 = inlined_call_operand.hbm [shape: f32[16,32], index: 0, kind: input, shape index: {}]   ;;  %s824_s1 = inlined_call_operand.hbm [shape: f32[32,128], index: 1, kind: input, shape index: {}]   ;;  %s825_s2 = inlined_call_operand.hbm [shape: f32[16,128], index: 2, kind: output, shape index: {}]  }
   0x1   :  { %8 = vsyncpa [#allocation8], 0 }
   0x2   :  { %9 = vsyncpa [#allocation6], 0 }
   0x3   :  { %11 = vsyncpa [#allocation6 + $0x1], 0  ;;  %s686_s9 = smov 0   ;;  %s688_s10 = smov 0  }
   0x4   :  { %s690_s11 = smov 0  }
   0x5 LB: > { %s438_s12 = sadd.s32 4294967295, %s661_s11   ;;  %s439_s13 = sadd.s32 4294967294, %s661_s11   ;;  %s661_s11 = sphi %s690_s11, %s17_s11   ;;  %s657_s10 = sphi %s688_s10, %s836_s10   ;;  %s653_s9 = sphi %s686_s9, %s835_s9  }
   0x6   : > { %s29_s14 = sadd.s32 1, %s657_s10  ;;  %p440_p0 = scmp.ge.s32.totalorder %s661_s11, 1 }
   0x7   : > { %p31_p1 = scmp.ge.s32.totalorder %s29_s14, 2  ;;  %p109_p2 = scmp.lt.s32.totalorder %s661_s11, 3 }
   0x8   : > { %p708_p3 = scmp.eq.s32.totalorder %s438_s12, 0  ;;  %s663_s17 = smov [#allocation4]  }
   0x9   : > { %s838_s14 = smov (%p31_p1, %s29_s14), 0  ;;  %p714_p4 = pnand %p440_p0, %p109_p2 }
   0xa   : > { %s829_s15 = scalar_select %p708_p3, 1, 0 }
   0xb   : > { %s830_s16 = scalar_select %p714_p4, 1, 0 }
   0xc   : > { %s124_s18 = sshll.u32 %s663_s17, 4  ;;  %p493_p5 = pneg %p714_p4  ;;  %s125_s18 = int_to_ptr.vmem [resolvable:$true] %s124_s18 }
   0xd   : > { %s664_s20 = smov [#allocation7]   ;;  %s545_s24 = scalar_lea.hbm %s823_s0, 256 }
   0xe   : > { %p722_p6 = pnand %p708_p3, %p493_p5  ;;  %s137_s21 = sshll.u32 %s664_s20, 4  ;;  %s726_s21 = int_to_ptr.vmem [resolvable:$true] %s137_s21 }
   0xf   : > { %p546_p7 = scmp.ne.s32.totalorder %s823_s0, %s545_s24  ;;  %p552_p11 = scmp.lt.u32.totalorder %s545_s24, %s823_s0 }
  0x10   : > { %p547_p8 = pneg %p722_p6 }
  0x12   : > { %p548_p9 = pnand %p547_p8, %p546_p7 }
  0x14   : > { %p549_p10 = pneg %p548_p9 }
  0x16   : > { %p554_p12 = pnand %p552_p11, %p549_p10 }
  0x18   : > { %557 = shalt.err (!%p554_p12)
}
  0x19   : > { %s558_s29 = scalar_lea.vmem %s125_s18, 256  ;;  %p566_p2 = scmp.lt.s32.totalorder %s125_s18, %s125_s18 }
  0x1a   : > { %p559_p13 = scmp.ne.s32.totalorder %s125_s18, %s558_s29  ;;  %p567_p5 = scmp.lt.s32.totalorder %s558_s29, %s558_s29 }
  0x1c   : > { %p561_p0 = pnand %p559_p13, %p547_p8  ;;  %p568_p3 = por %p567_p5, %p566_p2 }
  0x1e   : > { %p562_p1 = pneg %p561_p0 }
  0x20   : > { %p569_p4 = pnand %p568_p3, %p562_p1 }
  0x22   : > { %572 = shalt.err (!%p569_p4)
}
  0x23   : > { %s665_s30 = smov 128   ;;  %s666_s3 = smov 8  }
  0x24   : > { %496 = dma.hbm_to_vmem [thread:$0]  (!%p722_p6), %s823_s0, 256, %s125_s18, [#allocation5], %s665_s30, %s665_s30, %s666_s3  }
  0x25   : > { %s573_s8 = scalar_lea.hbm %s824_s1, 512 }
  0x26   : > { %p574_p7 = scmp.ne.s32.totalorder %s824_s1, %s573_s8  ;;  %p580_p9 = scmp.lt.u32.totalorder %s573_s8, %s824_s1 }
  0x28   : > { %p576_p3 = pnand %p574_p7, %p547_p8 }
  0x2a   : > { %p577_p4 = pneg %p576_p3 }
  0x2c   : > { %p582_p10 = pnand %p580_p9, %p577_p4 }
  0x2e   : > { %585 = shalt.err (!%p582_p10)
}
  0x2f   : > { %s586_s18 = scalar_lea.vmem %s726_s21, 512  ;;  %p594_p0 = scmp.lt.s32.totalorder %s726_s21, %s726_s21 }
  0x30   : > { %p587_p11 = scmp.ne.s32.totalorder %s726_s21, %s586_s18  ;;  %p595_p1 = scmp.lt.s32.totalorder %s586_s18, %s586_s18 }
  0x32   : > { %p589_p12 = pnand %p587_p11, %p547_p8  ;;  %p596_p2 = por %p595_p1, %p594_p0 }
  0x34   : > { %p590_p13 = pneg %p589_p12 }
  0x36   : > { %p597_p5 = pnand %p596_p2, %p590_p13 }
  0x38   : > { %600 = shalt.err (!%p597_p5)
}
  0x39   : > { %499 = dma.hbm_to_vmem [thread:$0]  (!%p722_p6), %s824_s1, 512, %s726_s21, [#allocation8], %s665_s30, %s665_s30, %s666_s3  }
  0x3a   : > { %p832_p7 = scmp.ne.s32.totalorder %s830_s16, 0 }
  0x3b   : > { %p833_p3 = scmp.ne.s32.totalorder (!%p832_p7), %s829_s15, 0 }
  0x3c   : > { %153 = sbr.rel (%p832_p7) target bundleno = 377 (0x179), region = 28 }
  0x43   : > { %640 = dma.done.wait (%p833_p3), [#allocation5], 256  }
  0x44   : > { %642 = vsyncadd (%p833_p3), [#allocation5], 4294967040 }
  0x45   : > { %644 = dma.done.wait (%p833_p3), [#allocation8], 512  }
  0x46   : > { %646 = vsyncadd (%p833_p3), [#allocation8], 4294966784  ;;  %vm183_vm0 = vcmask 261120   ;;  %v179_v0 = vld [vmem:[#allocation7] sm:$0xff]  ;;  %v180_v1 = vld [vmem:[#allocation7 + $0x8] sm:$0xff]  ;;  %p448_p6 = scmp.ne.s32.totalorder %s653_s9, 0 }
  0x47   : > { %v181_v2 = vld [vmem:[#allocation7 + $0x10] sm:$0xff]  ;;  %v473_v3 = vpack.c.bf16 %v180_v1, %v179_v0  ;;  %v182_v4 = vld [vmem:[#allocation7 + $0x18] sm:$0xff]  ;;  %v667_v13 = vmov (!%p448_p6), 0.0  }
  0x48   : > { %v177_v5 = vld [vmem:[#allocation4] sm:$0xff]  ;;  %v477_v6 = vpack.c.bf16 %v182_v4, %v181_v2  ;;  %v178_v7 = vld [vmem:[#allocation4 + $0x8] sm:$0xff]  ;;  %273 = vst [vmem:[#allocation2] sm:$0x1] (!%p448_p6), %v667_v13  ;;  %274 = vst [vmem:[#allocation3] sm:$0x1] (!%p448_p6), %v667_v13 }
  0x49   : > { %470 = vmatprep.mubr.msk.f32.mxu0 %vm183_vm0, %v177_v5  ;;  %474 = vmatprep.subr.bf16.mxu0 %v473_v3 }
  0x4a   : > { %476 = vmatpush3.bf16.msra.mxu0 %v473_v3 }
  0x4b   : > { %478 = vmatprep.subr.bf16.mxu0 %v477_v6 }
  0x4e   : > { %480 = vmatpush3.bf16.msra.mxu0 %v477_v6 }
  0x4f   : > { %v275_v24 = vld [vmem:[#allocation2] sm:$0x1] (!%p448_p6)  ;;  %v285_v27 = vld [vmem:[#allocation3] sm:$0x1] (!%p448_p6) }
  0x51   : > { %471 = vmatmul.mubr.msk.f32.vlgmr.msra.gmra.mrb[0].mxu0 %vm183_vm0, %v178_v7 }
 0x11f   : > { %268 = sbr.rel (%p448_p6) target bundleno = 340 (0x154), region = 40 }
 0x124   : > { %v472_v8 = vpop.f32.mrb[0].mxu0 }
 0x125   : > { %v256_v9 = vpop.f32.mrb[1].mxu0  ;;  %v287_v12 = vmul.f32 (!%p448_p6), %v472_v8, %v472_v8 }
 0x126   : > { %v276_v10 = vadd.f32 %v472_v8, %v256_v9  ;;  %v286_v11 = vmul.f32 %v256_v9, %v256_v9 }
 0x128   : > { %v277_v14 = vrot.slane %v276_v10, 4  ;;  %v288_v15 = vadd.f32 %v287_v12, %v286_v11 }
 0x12a   : > { %v278_v16 = vadd.f32 %v277_v14, %v276_v10  ;;  %v289_v17 = vrot.slane %v288_v15, 4 }
 0x12c   : > { %v279_v18 = vrot.slane %v278_v16, 2  ;;  %v290_v19 = vadd.f32 %v289_v17, %v288_v15 }
 0x12e   : > { %v280_v20 = vadd.f32 %v279_v18, %v278_v16  ;;  %v291_v21 = vrot.slane %v290_v19, 2 }
 0x130   : > { %v281_v22 = vrot.slane %v280_v20, 1  ;;  %v292_v23 = vadd.f32 %v291_v21, %v290_v19 }
 0x132   : > { %v282_v25 = vadd.f32 %v281_v22, %v280_v20  ;;  %v293_v26 = vrot.slane %v292_v23, 1 }
 0x134   : > { %v283_v28 = vadd.f32 %v282_v25, %v275_v24  ;;  %v294_v29 = vadd.f32 %v293_v26, %v292_v23 }
 0x136   : > { %284 = vst [vmem:[#allocation2] sm:$0x1] %v283_v28  ;;  %v295_v30 = vadd.f32 %v294_v29, %v285_v27 }
 0x138   : > { %296 = vst [vmem:[#allocation3] sm:$0x1] %v295_v30 }
 0x13d   : > { %v300_v31 = vld [vmem:[#allocation2] sm:$0x1] }
 0x13e   : > { %v301_v32 = vmul.f32 0.125, %v300_v31 }
 0x13f   : > { %v302_v33 = vld [vmem:[#allocation3] sm:$0x1] }
 0x140   : > { %v304_v34 = vmul.f32 %v301_v32, %v301_v32  ;;  %307 = vst [vmem:[#allocation2] sm:$0x1] %v301_v32  ;;  %v303_v35 = vmul.f32 0.125, %v302_v33 }
 0x142   : > { %v305_v36 = vsub.f32 %v303_v35, %v304_v34 }
 0x144   : > { %v306_v37 = vmax.f32 %v305_v36, 0.0 }
 0x146   : > { %v308_v38 = vadd.f32 0.0001, %v306_v37 }
 0x148   : > { %543 = vrsqrt.f32 %v308_v38 }
 0x152   : > { %v544_v39 = vpop.eup %543 }
 0x153   : > { %310 = vst [vmem:[#allocation3] sm:$0x1] %v544_v39 }
 0x154 PF: > { %p449_p8 = scmp.ne.s32.totalorder %s653_s9, 1 }
 0x155   : > { %v450_v40 = vld [vmem:[#allocation2] ss:$0 sm:$0xff] (!%p449_p8) }
 0x156   : > { %314 = sbr.rel (%p449_p8) target bundleno = 353 (0x161), region = 52  ;;  %v322_v42 = vsub.f32 (!%p449_p8), %v256_v9, %v450_v40  ;;  %v323_v43 = vsub.f32 (!%p449_p8), %v472_v8, %v450_v40 }
 0x15a   : > { %v451_v41 = vld [vmem:[#allocation3] ss:$0 sm:$0xff] (!%p449_p8) }
 0x15b   : > { %v331_v44 = vmul.f32 (!%p449_p8), %v451_v41, %v322_v42  ;;  %v332_v45 = vmul.f32 (!%p449_p8), %v451_v41, %v323_v43 }
 0x15d   : > { %vm333_vm1 = vcmp.gt.f32.partialorder %v331_v44, 0.0  ;;  %v335_v46 = vmul.f32 0.01, %v331_v44  ;;  %vm334_vm2 = vcmp.gt.f32.partialorder %v332_v45, 0.0  ;;  %v336_v47 = vmul.f32 0.01, %v332_v45 }
 0x15f   : > { %v337_v48 = vsel %vm333_vm1, %v331_v44, %v335_v46  ;;  %v338_v49 = vsel %vm334_vm2, %v332_v45, %v336_v47 }
 0x160   : > { %339 = vst [vmem:[#allocation9] sm:$0xff] %v337_v48  ;;  %340 = vst [vmem:[#allocation9 + $0x8] sm:$0xff] %v338_v49 }
 0x161 PF: > { %p789_p4 = scmp.eq.s32.totalorder %s438_s12, 1  ;;  %s668_s15 = smov [#allocation9]  }
 0x162   : > { %s356_s16 = sshll.u32 %s668_s15, 4  ;;  %s357_s16 = int_to_ptr.vmem [resolvable:$true] %s356_s16 }
 0x163   : > { %s601_s19 = scalar_lea.vmem %s357_s16, 256  ;;  %s607_s21 = scalar_lea.vmem %s357_s16, 512 }
 0x164   : > { %p602_p9 = scmp.ne.s32.totalorder %s357_s16, %s601_s19  ;;  %p608_p12 = scmp.lt.s32.totalorder %s357_s16, %s357_s16 }
 0x165   : > { %p609_p13 = scmp.lt.s32.totalorder %s607_s21, %s601_s19 }
 0x166   : > { %p603_p10 = pnand %p602_p9, %p789_p4 }
 0x167   : > { %p610_p0 = por %p609_p13, %p608_p12 }
 0x168   : > { %p604_p11 = pneg %p603_p10 }
 0x16a   : > { %p611_p1 = pnand %p610_p0, %p604_p11 }
 0x16c   : > { %614 = shalt.err (!%p611_p1)
}
 0x16d   : > { %s615_s27 = scalar_lea.hbm %s825_s2, 256 }
 0x16e   : > { %p616_p2 = scmp.ne.s32.totalorder %s825_s2, %s615_s27  ;;  %p621_p3 = scmp.lt.u32.totalorder %s615_s27, %s825_s2 }
 0x170   : > { %p617_p5 = pnand %p616_p2, %p789_p4 }
 0x172   : > { %p618_p7 = pneg %p617_p5 }
 0x174   : > { %p623_p6 = pnand %p621_p3, %p618_p7 }
 0x176   : > { %626 = shalt.err (!%p623_p6)
}
 0x177   : > { %s669_s4 = smov 128   ;;  %s670_s5 = smov 8  }
 0x178   : > { %490 = dma.vmem_to_hbm [thread:$0]  (%p789_p4), %s357_s16, 256, %s825_s2, [#allocation6], %s669_s4, %s669_s4, %s670_s5  }
 0x179 PF: > { %p509_p8 = scmp.ge.s32.totalorder %s661_s11, 2  ;;  %p510_p9 = scmp.eq.s32.totalorder %s439_s13, 1 }
 0x17b   : > { %p501_p10 = pnand %p510_p9, %p509_p8 }
 0x17d   : > { %648 = dma.done.wait (!%p501_p10), [#allocation6], 256  }
 0x17e   : > { %650 = vsyncadd (!%p501_p10), [#allocation6], 4294967040  ;;  %s17_s11 = sadd.s32 1, %s661_s11   ;;  %s835_s9 = smov %s657_s10 }
 0x17f   : > { %p14_p11 = scmp.ge.s32.totalorder %s17_s11, 4   ;;  %s836_s10 = smov %s838_s14 }
 0x181   :  { %16 = sbr.rel (!%p14_p11) target bundleno = 5 (0x5), region = 86 }
 0x188   :  { %377 = vsyncpa [#allocation5], 1 }
 0x189   :  { %379 = vsyncpa [#allocation5 + $0x1], 1 }
 0x18a   :  { %380 = vsyncpa [#allocation8], 1 }
 0x18b   :  { %381 = vsyncpa [#allocation6], 1 }
 0x18c   :  { %383 = vsyncpa [#allocation6 + $0x1], 1 }

</bundles_post_ra>
